<compile_context>
chip_gen: v6e
topology: v6e:2x2x1
jax: 0.10.0
libtpu: 0.0.40
codegen_flags: <defaults>
</compile_context>

<pallas_src>
import jax
import jax.numpy as jnp
import numpy as np
from jax.experimental import pallas as pl
from jax.experimental.pallas import tpu as pltpu

_E4M3_MAX = 448.0
_EPS = 1e-12
_RNE_MAGIC = 8388608.0  # 2**23 : add/sub rounds |v| < 2**23 to integer with RNE


# --------------------------------------------------------------------------- #
# Kernels
# --------------------------------------------------------------------------- #
def _fq_kernel(x_ref, o_ref):
    """Emulated float8_e4m3fn round-trip (runs on any TPU generation)."""
    x = x_ref[...].astype(jnp.float32)
    ax = jnp.abs(x)

    # rowwise scale (per-row ops are negligible vs the tm*n elementwise work)
    amax = jnp.max(ax, axis=-1, keepdims=True)
    scale = jnp.maximum(amax, _EPS) / _E4M3_MAX     # matches torch's f32 scale
    inv_scale = 1.0 / scale                         # per-row reciprocal
    # TODO(synk): torch computes the clamp/div in float64; f32 differs only in
    # the degenerate amax < 1e-12 case.

    # |x| / scale via broadcast multiply (<= ~1 ulp from torch's divide; fine
    # for fake-quant, can flip an fp8 bucket only exactly at a rounding edge).
    a = ax * inv_scale

    # Emulate cast to float8_e4m3fn and back: round-to-nearest-even to 3
    # mantissa bits, subnormal step 2^-9, saturation at 448. Pure VPU ops.
    bits = pltpu.bitcast(a, jnp.int32)              # a >= 0 -> sign bit clear
    exp = (bits >> 23) - 127                        # unbiased f32 exponent
    step_exp = jnp.maximum(exp - 3, -9)             # quantization step exponent
    step = pltpu.bitcast((step_exp + 127) << 23, jnp.float32)      # 2^step_exp
    inv_step = pltpu.bitcast((127 - step_exp) << 23, jnp.float32)  # 2^-step_exp
    r = a * inv_step                                # exact power-of-two scaling
    r = (r + _RNE_MAGIC) - _RNE_MAGIC               # round to nearest, ties even
    q = jnp.minimum(r * step, _E4M3_MAX)            # saturate like torch's cast

    # Re-attach the sign with a bit-OR (cheaper than compare+select, keeps -0.0).
    sign = pltpu.bitcast(x, jnp.int32) & jnp.int32(-(1 << 31))
    xq = pltpu.bitcast(pltpu.bitcast(q, jnp.int32) | sign, jnp.float32)

    o_ref[...] = (xq * scale).astype(o_ref.dtype)


def _fq_kernel_native(x_ref, o_ref):
    """Native fp8 fast path (v6e/v7x): hardware e4m3 convert replaces emulation."""
    x = x_ref[...].astype(jnp.float32)
    ax = jnp.abs(x)
    amax = jnp.max(ax, axis=-1, keepdims=True)
    scale = jnp.maximum(amax, _EPS) / _E4M3_MAX
    inv_scale = 1.0 / scale
    # Clamp before the cast so out-of-range values saturate (matches torch).
    xs = jnp.clip(x * inv_scale, -_E4M3_MAX, _E4M3_MAX)
    q = xs.astype(jnp.float8_e4m3fn).astype(jnp.float32)
    o_ref[...] = (q * scale).astype(o_ref.dtype)


# --------------------------------------------------------------------------- #
# Tile sizing (generation aware)
# --------------------------------------------------------------------------- #
def _tpu_vmem_capacity_bytes() -> int:
    try:
        return int(pltpu.get_tpu_info().vmem_capacity_bytes)
    except Exception:
        return 64 * 1024 * 1024  # conservative (v7x-sized) fallback


def _choose_tm(m: int, n: int, itemsize: int) -> int:
    """Pick a row tile: few-MiB blocks, capped at ~45% of VMEM capacity."""
    cap = _tpu_vmem_capacity_bytes()
    # Per-row VMEM estimate: double-buffered input + output blocks (in x dtype)
    # plus ~2x f32-tile worth of elementwise intermediates.
    bytes_per_row = n * (4 * itemsize + 2 * 4)
    tm_vmem = int(0.45 * cap) // max(1, bytes_per_row)
    # Target an ~8 MiB input block, clamped to 256..1024 rows.
    tm_target = max(256, min(1024, (8 * 1024 * 1024) // max(1, n * itemsize)))
    tm_cap = max(8, min(tm_target, tm_vmem))
    # TODO(synk): rows so wide that a handful of them overflow VMEM would need a
    # two-pass rowwise reduction; not handled here.
    if m <= tm_cap:
        return m  # single full-extent block (always a legal block shape)
    if tm_cap >= 32:
        return (tm_cap // 32) * 32  # multiple of 32: safe sublane packing for any dtype
    return (tm_cap // 8) * 8


# --------------------------------------------------------------------------- #
# Wrapper
# --------------------------------------------------------------------------- #
def float8_rowwise_activation_fake_quant(
    x, enabled: bool = True, tm: int | None = None, use_native_fp8: bool = False
):
    """JAX/Pallas equivalent of _Float8RowwiseActivationFakeQuantizer.forward."""
    if not enabled:
        return x

    orig_shape = x.shape
    n = orig_shape[-1]
    x2 = x.reshape(-1, n)          # no dtype change: bf16 streams as bf16
    m = x2.shape[0]

    itemsize = x2.dtype.itemsize
    if tm is None:
        tm = _choose_tm(m, n, itemsize)
    grid_m = pl.cdiv(m, tm)        # partial last block instead of pad/slice

    kernel = _fq_kernel_native if use_native_fp8 else _fq_kernel
    vmem_limit = int(0.75 * _tpu_vmem_capacity_bytes())

    out = pl.pallas_call(
        kernel,
        out_shape=jax.ShapeDtypeStruct((m, n), x.dtype),
        grid=(grid_m,),
        in_specs=[pl.BlockSpec((tm, n), lambda i: (i, 0))],
        out_specs=pl.BlockSpec((tm, n), lambda i: (i, 0)),
        compiler_params=pltpu.CompilerParams(
            dimension_semantics=("parallel",),
            vmem_limit_bytes=vmem_limit,
        ),
    )(x2)

    return out.reshape(orig_shape)


# --------------------------------------------------------------------------- #
# Reference (pure JAX, native fp8 cast) for sanity checking only
# --------------------------------------------------------------------------- #
def _reference(x):
    xf = x.astype(jnp.float32)
    amax = jnp.max(jnp.abs(xf), axis=-1, keepdims=True)
    scale = jnp.maximum(amax, _EPS) / _E4M3_MAX
    xq = (xf / scale).astype(jnp.float8_e4m3fn).astype(jnp.float32)
    return (xq * scale).astype(x.dtype)


if __name__ == "__main__":
    key = jax.random.PRNGKey(0)
    k1, k2 = jax.random.split(key)

    # f32 activations: (batch=2, seq=9, hidden=256); hidden = quantization axis.
    x = jax.random.normal(k1, (2, 9, 256), dtype=jnp.float32) * 3.0
    ref = jax.block_until_ready(_reference(x))

    # auto-tiled path (single full-extent block for this small input)
    out = jax.block_until_ready(float8_rowwise_activation_fake_quant(x))
    # one fp8 quantization step of slack (relative 2^-3, plus subnormal atol)
    np.testing.assert_allclose(np.asarray(out), np.asarray(ref), rtol=0.13, atol=1e-2)

    # forced small tile -> exercises the partial-last-block (no-pad) path
    out_pb = jax.block_until_ready(float8_rowwise_activation_fake_quant(x, tm=8))
    np.testing.assert_allclose(np.asarray(out_pb), np.asarray(ref), rtol=0.13, atol=1e-2)

    # bf16 activations stream as bf16; upcast happens inside the kernel
    xb = (jax.random.normal(k2, (2, 8, 128), dtype=jnp.float32) * 3.0).astype(jnp.bfloat16)
    outb = jax.block_until_ready(float8_rowwise_activation_fake_quant(xb))
    refb = jax.block_until_ready(_reference(xb))
    np.testing.assert_allclose(
        np.asarray(outb.astype(jnp.float32)),
        np.asarray(refb.astype(jnp.float32)),
        rtol=0.14,
        atol=2e-2,
    )

    # disabled path is identity
    out_disabled = jax.block_until_ready(
        float8_rowwise_activation_fake_quant(x, enabled=False)
    )
    np.testing.assert_array_equal(np.asarray(out_disabled), np.asarray(x))

    # Optional native-fp8 fast path (v6e/v7x): verified when the in-kernel
    # e4m3 convert lowers on this chip, silently skipped otherwise.
    try:
        out_n = jax.block_until_ready(
            float8_rowwise_activation_fake_quant(x, use_native_fp8=True)
        )
        np.testing.assert_allclose(np.asarray(out_n), np.asarray(ref), rtol=0.13, atol=1e-2)
    except Exception:
        pass

    print("KERNEL_OK")
</pallas_src>

<mosaic_0001>
module attributes {stable_mosaic.version = 11 : i64} {
  func.func @_fq_kernel(%arg0: i32, %arg1: memref<18x256xf32, #tpu.memory_space<vmem>>, %arg2: memref<18x256xf32, #tpu.memory_space<vmem>>) attributes {dimension_semantics = [#tpu.dimension_semantics<parallel>], iteration_bounds = array<i64: 1>, scalar_prefetch = 0 : i64, scratch_operands = 0 : i64, tpu.core_type = #tpu.core_type<tc>, window_params = [{transform_indices = @transform_0, window_bounds = array<i64: 18, 256>}, {transform_indices = @transform_1, window_bounds = array<i64: 18, 256>}]} {
    %c0 = arith.constant 0 : index
    %c0_0 = arith.constant 0 : index
    %0 = vector.load %arg1[%c0, %c0_0] : memref<18x256xf32, #tpu.memory_space<vmem>>, vector<18x256xf32>
    %1 = math.absf %0 : vector<18x256xf32>
    %cst = arith.constant dense<0xFF800000> : vector<18xf32>
    %2 = vector.multi_reduction <maximumf>, %1, %cst [1] : vector<18x256xf32> to vector<18xf32>
    %3 = vector.shape_cast %2 : vector<18xf32> to vector<18x1xf32>
    %cst_1 = arith.constant 9.99999996E-13 : f32
    %4 = vector.broadcast %cst_1 : f32 to vector<18x1xf32>
    %5 = arith.maximumf %3, %4 : vector<18x1xf32>
    %cst_2 = arith.constant 4.480000e+02 : f32
    %6 = vector.broadcast %cst_2 : f32 to vector<18x1xf32>
    %7 = arith.divf %5, %6 : vector<18x1xf32>
    %cst_3 = arith.constant 1.000000e+00 : f32
    %8 = vector.broadcast %cst_3 : f32 to vector<18x1xf32>
    %9 = arith.divf %8, %7 : vector<18x1xf32>
    %10 = vector.broadcast %9 : vector<18x1xf32> to vector<18x256xf32>
    %11 = arith.mulf %1, %10 : vector<18x256xf32>
    %12 = tpu.bitcast %11 : vector<18x256xf32> -> vector<18x256xi32>
    %c23_i32 = arith.constant 23 : i32
    %13 = vector.broadcast %c23_i32 : i32 to vector<18x256xi32>
    %14 = arith.shrsi %12, %13 : vector<18x256xi32>
    %c127_i32 = arith.constant 127 : i32
    %15 = vector.broadcast %c127_i32 : i32 to vector<18x256xi32>
    %16 = arith.subi %14, %15 : vector<18x256xi32>
    %c3_i32 = arith.constant 3 : i32
    %17 = vector.broadcast %c3_i32 : i32 to vector<18x256xi32>
    %18 = arith.subi %16, %17 : vector<18x256xi32>
    %c-9_i32 = arith.constant -9 : i32
    %19 = vector.broadcast %c-9_i32 : i32 to vector<18x256xi32>
    %20 = arith.maxsi %18, %19 : vector<18x256xi32>
    %c127_i32_4 = arith.constant 127 : i32
    %21 = vector.broadcast %c127_i32_4 : i32 to vector<18x256xi32>
    %22 = arith.addi %20, %21 : vector<18x256xi32>
    %c23_i32_5 = arith.constant 23 : i32
    %23 = vector.broadcast %c23_i32_5 : i32 to vector<18x256xi32>
    %24 = arith.shli %22, %23 : vector<18x256xi32>
    %25 = tpu.bitcast %24 : vector<18x256xi32> -> vector<18x256xf32>
    %c127_i32_6 = arith.constant 127 : i32
    %26 = vector.broadcast %c127_i32_6 : i32 to vector<18x256xi32>
    %27 = arith.subi %26, %20 : vector<18x256xi32>
    %c23_i32_7 = arith.constant 23 : i32
    %28 = vector.broadcast %c23_i32_7 : i32 to vector<18x256xi32>
    %29 = arith.shli %27, %28 : vector<18x256xi32>
    %30 = tpu.bitcast %29 : vector<18x256xi32> -> vector<18x256xf32>
    %31 = arith.mulf %11, %30 : vector<18x256xf32>
    %cst_8 = arith.constant 0x4B000000 : f32
    %32 = vector.broadcast %cst_8 : f32 to vector<18x256xf32>
    %33 = arith.addf %31, %32 : vector<18x256xf32>
    %cst_9 = arith.constant 0x4B000000 : f32
    %34 = vector.broadcast %cst_9 : f32 to vector<18x256xf32>
    %35 = arith.subf %33, %34 : vector<18x256xf32>
    %36 = arith.mulf %35, %25 : vector<18x256xf32>
    %cst_10 = arith.constant 4.480000e+02 : f32
    %37 = vector.broadcast %cst_10 : f32 to vector<18x256xf32>
    %38 = arith.minimumf %36, %37 : vector<18x256xf32>
    %39 = tpu.bitcast %0 : vector<18x256xf32> -> vector<18x256xi32>
    %c-2147483648_i32 = arith.constant -2147483648 : i32
    %40 = vector.broadcast %c-2147483648_i32 : i32 to vector<18x256xi32>
    %41 = arith.andi %39, %40 : vector<18x256xi32>
    %42 = tpu.bitcast %38 : vector<18x256xf32> -> vector<18x256xi32>
    %43 = arith.ori %42, %41 : vector<18x256xi32>
    %44 = tpu.bitcast %43 : vector<18x256xi32> -> vector<18x256xf32>
    %45 = vector.broadcast %7 : vector<18x1xf32> to vector<18x256xf32>
    %46 = arith.mulf %44, %45 : vector<18x256xf32>
    %c0_11 = arith.constant 0 : index
    %c0_12 = arith.constant 0 : index
    %47 = vector.load %arg2[%c0_11, %c0_12] : memref<18x256xf32, #tpu.memory_space<vmem>>, vector<18x256xf32>
    tpu.vector_store %arg2[%c0_11, %c0_12], %46 {strides = array<i32>} : memref<18x256xf32, #tpu.memory_space<vmem>>, vector<18x256xf32>,
    return
  }
  func.func @transform_0(%arg0: i32) -> (i32, i32) {
    %c0_i32 = arith.constant 0 : i32
    %c0_i32_0 = arith.constant 0 : i32
    return %arg0, %c0_i32 : i32, i32
  }
  func.func @transform_1(%arg0: i32) -> (i32, i32) {
    %c0_i32 = arith.constant 0 : i32
    %c0_i32_0 = arith.constant 0 : i32
    return %arg0, %c0_i32 : i32, i32
  }
}

</mosaic_0001>

<bundles_post_ra>
// kernel: tpu_custom_call.1
= control target key start
LH: loop header
LB: loop body
LE: loop exit
PB: predicated region body
PF: predicated region fallthrough
CT: control target
= control target key end

     0   :  { %6 = vsyncpa [#allocation3], 0  ;;  %s372_s0 = inlined_call_operand.hbm [shape: f32[18,256], index: 0, kind: input, shape index: {}]   ;;  %s373_s1 = inlined_call_operand.hbm [shape: f32[18,256], index: 1, kind: output, shape index: {}]  }
   0x1   :  { %7 = vsyncpa [#allocation4], 0  ;;  %s299_s6 = smov [#allocation2]  }
   0x2   :  { %s13_s7 = sshll.u32 %s299_s6, 4  ;;  %s14_s7 = int_to_ptr.vmem [resolvable:$true] %s13_s7 }
   0x3   :  { %s263_s8 = scalar_lea.vmem %s14_s7, 768  ;;  %p268_p1 = scmp.lt.s32.totalorder %s14_s7, %s14_s7 }
   0x4   :  { %p264_p0 = scmp.ne.s32.totalorder %s14_s7, %s263_s8  ;;  %p269_p2 = scmp.lt.s32.totalorder %s263_s8, %s263_s8 }
   0x6   :  { %p270_p3 = por %p269_p2, %p268_p1 }
   0x8   :  { %p271_p4 = pnand %p270_p3, %p264_p0 }
   0xa   :  { %274 = shalt.err (!%p271_p4)
}
   0xb   :  { %s300_s9 = smov 256   ;;  %s301_s10 = smov 16  }
   0xc   :  { %19 = dma.hbm_to_vmem [thread:$0]  %s372_s0, 768, %s14_s7, [#allocation3], %s300_s9, %s300_s9, %s301_s10  }
   0xd   :  { %295 = dma.done.wait [#allocation3], 768  }
   0xe   :  { %296 = vsyncadd [#allocation3], 4294966528  ;;  %v319_v0 = vld [vmem:[#allocation2] sm:$0xff]  ;;  %v321_v1 = vld [vmem:[#allocation2 + $0x8] sm:$0xff]  ;;  %vm41_vm0 = vcmask 1041408   ;;  %s302_s0 = smov [#allocation5]  }
   0xf   :  { %v323_v2 = vld [vmem:[#allocation2 + $0x20] sm:$0x3]  ;;  %v29_v3 = vand.u32 2147483647, %v319_v0  ;;  %v30_v4 = vand.u32 2147483647, %v321_v1 }
  0x10   :  { %v327_v5 = vld [vmem:[#allocation2 + $0x28] sm:$0x3]  ;;  %v33_v6 = vand.u32 2147483647, %v323_v2  ;;  %v330_v7 = vld [vmem:[#allocation2 + $0x10] sm:$0xff]  ;;  %v333_v10 = vld [vmem:[#allocation2 + $0x18] sm:$0xff] }
  0x11   :  { %v35_v8 = vmax.f32 %v29_v3, %v30_v4  ;;  %v34_v9 = vand.u32 2147483647, %v327_v5  ;;  %v31_v11 = vand.u32 2147483647, %v330_v7  ;;  %v32_v13 = vand.u32 2147483647, %v333_v10 }
  0x12   :  { %v42_v12 = vsel %vm41_vm0, %v33_v6, -inf  ;;  %v174_v63 = vand.u32 2147483648, %v319_v0  ;;  %s215_s13 = sshll.u32 %s302_s0, 4  ;;  %s216_s13 = int_to_ptr.vmem [resolvable:$true] %s215_s13 }
  0x13   :  { %36 = vmax.xlane.f32.xlu0 %v35_v8  ;;  %v43_v14 = vsel %vm41_vm0, %v34_v9, -inf  ;;  %v38_v16 = vmax.f32 %v31_v11, %v32_v13  ;;  %s275_s14 = scalar_lea.vmem %s216_s13, 768  ;;  %p280_p6 = scmp.lt.s32.totalorder %s216_s13, %s216_s13 }
  0x14   :  { %v44_v15 = vmax.f32 %v42_v12, %v43_v14  ;;  %v179_v14 = vand.u32 2147483648, %v327_v5  ;;  %p276_p5 = scmp.ne.s32.totalorder %s216_s13, %s275_s14  ;;  %p281_p7 = scmp.lt.s32.totalorder %s275_s14, %s275_s14 }
  0x16   :  { %45 = vmax.xlane.f32.xlu1 %v44_v15  ;;  %p282_p8 = por %p281_p7, %p280_p6 }
  0x17   :  { %39 = vmax.xlane.f32.xlu0 %v38_v16 }
  0x18   :  { %p283_p9 = pnand %p282_p8, %p276_p5 }
  0x9c   :  { %v37_v17 = vpop.xlane.xlu0 %36 }
  0x9d   :  { %v47_v18 = vmax.f32 %v37_v17, 1e-12 }
  0x9f   :  { %v337_v19 = vmul.f32 0.002232143, %v47_v18  ;;  %v46_v20 = vpop.xlane.xlu1 %45 }
  0xa0   :  { %v49_v21 = vmax.f32 %v46_v20, 1e-12  ;;  %v40_v22 = vpop.xlane.xlu0 %39 }
  0xa1   :  { %249 = vrcp.f32 %v337_v19  ;;  %v48_v23 = vmax.f32 %v40_v22, 1e-12 }
  0xa2   :  { %v340_v24 = vmul.f32 0.002232143, %v49_v21 }
  0xa3   :  { %v342_v25 = vmul.f32 0.002232143, %v48_v23 }
  0xa4   :  { %251 = vrcp.f32 %v340_v24 }
  0xa5   :  { %253 = vrcp.f32 %v342_v25 }
  0xae   :  { %v250_v26 = vpop.eup %249 }
  0xaf   :  { %v60_v27 = vmul.f32 %v250_v26, %v29_v3  ;;  %v61_v28 = vmul.f32 %v250_v26, %v30_v4  ;;  %v175_v3 = vand.u32 2147483648, %v321_v1 }
  0xb1   :  { %v252_v29 = vpop.eup %251  ;;  %v72_v30 = vshra.s32 %v60_v27, 23  ;;  %v73_v31 = vshra.s32 %v61_v28, 23 }
  0xb2   :  { %v254_v32 = vpop.eup %253  ;;  %v64_v33 = vmul.f32 %v252_v29, %v33_v6  ;;  %v65_v34 = vmul.f32 %v252_v29, %v34_v9 }
  0xb3   :  { %v227_v35 = vadd.s32 4294967169, %v72_v30  ;;  %v228_v36 = vadd.s32 4294967169, %v73_v31  ;;  %v346_v37 = vmul.f32 %v254_v32, %v31_v11  ;;  %v348_v38 = vmul.f32 %v254_v32, %v32_v13 }
  0xb4   :  { %v76_v39 = vshra.s32 %v64_v33, 23  ;;  %v77_v40 = vshra.s32 %v65_v34, 23  ;;  %v178_v13 = vand.u32 2147483648, %v323_v2 }
  0xb5   :  { %v233_v41 = vadd.s32 4294967293, %v227_v35  ;;  %v234_v42 = vadd.s32 4294967293, %v228_v36  ;;  %v74_v43 = vshra.s32 %v346_v37, 23  ;;  %v75_v44 = vshra.s32 %v348_v38, 23 }
  0xb6   :  { %v231_v45 = vadd.s32 4294967169, %v76_v39  ;;  %v232_v46 = vadd.s32 4294967169, %v77_v40 }
  0xb7   :  { %vm90_vm1 = vcmp.gt.s32.totalorder %v233_v41, 4294967287  ;;  %vm92_vm2 = vcmp.gt.s32.totalorder %v234_v42, 4294967287  ;;  %v229_v47 = vadd.s32 4294967169, %v74_v43  ;;  %v230_v48 = vadd.s32 4294967169, %v75_v44 }
  0xb8   :  { %v91_v49 = vsel %vm90_vm1, %v233_v41, 4294967287  ;;  %v93_v50 = vsel %vm92_vm2, %v234_v42, 4294967287  ;;  %v237_v51 = vadd.s32 4294967293, %v231_v45  ;;  %v238_v52 = vadd.s32 4294967293, %v232_v46 }
  0xb9   :  { %v120_v53 = vsub.s32 127, %v91_v49  ;;  %v121_v54 = vsub.s32 127, %v93_v50  ;;  %v235_v55 = vadd.s32 4294967293, %v229_v47  ;;  %v236_v56 = vadd.s32 4294967293, %v230_v48 }
  0xba   :  { %vm98_vm3 = vcmp.gt.s32.totalorder %v237_v51, 4294967287  ;;  %vm100_vm4 = vcmp.gt.s32.totalorder %v238_v52, 4294967287  ;;  %v102_v57 = vadd.s32 127, %v91_v49  ;;  %v103_v58 = vadd.s32 127, %v93_v50 }
  0xbb   :  { %v126_v59 = vshll.u32 %v120_v53, 23  ;;  %v127_v60 = vshll.u32 %v121_v54, 23  ;;  %v99_v61 = vsel %vm98_vm3, %v237_v51, 4294967287  ;;  %v101_v62 = vsel %vm100_vm4, %v238_v52, 4294967287 }
  0xbc   :  { %vm94_vm5 = vcmp.gt.s32.totalorder %v235_v55, 4294967287  ;;  %vm96_vm6 = vcmp.gt.s32.totalorder %v236_v56, 4294967287  ;;  %v124_v8 = vsub.s32 127, %v99_v61  ;;  %v125_v9 = vsub.s32 127, %v101_v62 }
  0xbd   :  { %v138_v4 = vmul.f32 %v126_v59, %v60_v27  ;;  %v139_v6 = vmul.f32 %v127_v60, %v61_v28  ;;  %v95_v11 = vsel %vm94_vm5, %v235_v55, 4294967287  ;;  %v97_v12 = vsel %vm96_vm6, %v236_v56, 4294967287 }
  0xbe   :  { %v108_v17 = vshll.u32 %v102_v57, 23  ;;  %v109_v18 = vshll.u32 %v103_v58, 23  ;;  %v130_v20 = vshll.u32 %v124_v8, 23  ;;  %v131_v21 = vshll.u32 %v125_v9, 23 }
  0xbf   :  { %v144_v15 = vadd.f32 8388608.0, %v138_v4  ;;  %v145_v16 = vadd.f32 8388608.0, %v139_v6  ;;  %v122_v23 = vsub.s32 127, %v95_v11  ;;  %v123_v1 = vsub.s32 127, %v97_v12 }
  0xc0   :  { %v106_v26 = vadd.s32 127, %v99_v61  ;;  %v107_v27 = vadd.s32 127, %v101_v62  ;;  %v142_v28 = vmul.f32 %v130_v20, %v64_v33  ;;  %v143_v29 = vmul.f32 %v131_v21, %v65_v34 }
  0xc1   :  { %v239_v22 = vadd.f32 -8388608.0, %v144_v15  ;;  %v240_v0 = vadd.f32 -8388608.0, %v145_v16  ;;  %v128_v32 = vshll.u32 %v122_v23, 23  ;;  %v129_v2 = vshll.u32 %v123_v1, 23 }
  0xc2   :  { %v148_v35 = vadd.f32 8388608.0, %v142_v28  ;;  %v149_v5 = vadd.f32 8388608.0, %v143_v29  ;;  %v104_v36 = vadd.s32 127, %v95_v11  ;;  %v105_v39 = vadd.s32 127, %v97_v12 }
  0xc3   :  { %v156_v30 = vmul.f32 %v239_v22, %v108_v17  ;;  %v157_v31 = vmul.f32 %v240_v0, %v109_v18  ;;  %v140_v42 = vmul.f32 %v128_v32, %v346_v37  ;;  %v141_v43 = vmul.f32 %v129_v2, %v348_v38 }
  0xc4   :  { %v112_v44 = vshll.u32 %v106_v26, 23  ;;  %v113_v45 = vshll.u32 %v107_v27, 23  ;;  %v243_v46 = vadd.f32 -8388608.0, %v148_v35  ;;  %v244_v47 = vadd.f32 -8388608.0, %v149_v5 }
  0xc5   :  { %v162_v40 = vmin.f32 %v156_v30, 448.0  ;;  %v163_v41 = vmin.f32 %v157_v31, 448.0  ;;  %v146_v48 = vadd.f32 8388608.0, %v140_v42  ;;  %v147_v49 = vadd.f32 8388608.0, %v141_v43 }
  0xc6   :  { %v160_v50 = vmul.f32 %v243_v46, %v112_v44  ;;  %v161_v51 = vmul.f32 %v244_v47, %v113_v45  ;;  %v110_v52 = vshll.u32 %v104_v36, 23  ;;  %v111_v53 = vshll.u32 %v105_v39, 23 }
  0xc7   :  { %v186_v33 = vor.u32 %v174_v63, %v162_v40  ;;  %v187_v34 = vor.u32 %v175_v3, %v163_v41  ;;  %v241_v56 = vadd.f32 -8388608.0, %v146_v48  ;;  %v242_v37 = vadd.f32 -8388608.0, %v147_v49 }
  0xc8   :  { %v166_v57 = vmin.f32 %v160_v50, 448.0  ;;  %v167_v38 = vmin.f32 %v161_v51, 448.0  ;;  %v176_v58 = vand.u32 2147483648, %v330_v7  ;;  %v177_v59 = vand.u32 2147483648, %v333_v10 }
  0xc9   :  { %v198_v54 = vmul.f32 %v186_v33, %v337_v19  ;;  %v199_v55 = vmul.f32 %v187_v34, %v337_v19  ;;  %v158_v60 = vmul.f32 %v241_v56, %v110_v52  ;;  %v159_v61 = vmul.f32 %v242_v37, %v111_v53 }
  0xca   :  { %v190_v62 = vor.u32 %v178_v13, %v166_v57  ;;  %v191_v63 = vor.u32 %v179_v14, %v167_v38 }
  0xcb   :  { %204 = vst [vmem:[#allocation5] sm:$0xff] %v198_v54  ;;  %205 = vst [vmem:[#allocation5 + $0x8] sm:$0xff] %v199_v55  ;;  %v164_v3 = vmin.f32 %v158_v60, 448.0  ;;  %v165_v4 = vmin.f32 %v159_v61, 448.0 }
  0xcc   :  { %v202_v6 = vmul.f32 %v190_v62, %v340_v24  ;;  %v203_v19 = vmul.f32 %v191_v63, %v340_v24 }
  0xcd   :  { %v188_v8 = vor.u32 %v176_v58, %v164_v3  ;;  %v189_v9 = vor.u32 %v177_v59, %v165_v4 }
  0xce   :  { %208 = vst [vmem:[#allocation5 + $0x20] sm:$0x3] %v202_v6  ;;  %209 = vst [vmem:[#allocation5 + $0x28] sm:$0x3] %v203_v19 }
  0xcf   :  { %v200_v7 = vmul.f32 %v188_v8, %v342_v25  ;;  %v201_v10 = vmul.f32 %v189_v9, %v342_v25 }
  0xd1   :  { %206 = vst [vmem:[#allocation5 + $0x10] sm:$0xff] %v200_v7  ;;  %207 = vst [vmem:[#allocation5 + $0x18] sm:$0xff] %v201_v10 }
  0xd2   :  { %286 = shalt.err (!%p283_p9)
}
  0xd3   :  { %221 = dma.vmem_to_hbm [thread:$0]  %s216_s13, 768, %s373_s1, [#allocation4], %s300_s9, %s300_s9, %s301_s10  }
  0xd4   :  { %297 = dma.done.wait [#allocation4], 768  }
  0xd5   :  { %298 = vsyncadd [#allocation4], 4294966528 }
  0xd6   :  { %225 = vsyncpa [#allocation3], 1 }
  0xd7   :  { %226 = vsyncpa [#allocation4], 1 }

</bundles_post_ra>
